<compile_context>
chip_gen: v6e
topology: v6e:2x2x1
jax: 0.10.0
libtpu: 0.0.40
codegen_flags: <defaults>
</compile_context>

<pallas_src>
import jax
import jax.numpy as jnp
from jax import lax
from jax.experimental import pallas as pl
from jax.experimental.pallas import tpu as pltpu


def _layernorm(x, gamma, beta, eps=1e-5):
    # x: (M, E); gamma/beta: (1, E). Biased variance (matches PyTorch LayerNorm).
    mean = jnp.mean(x, axis=-1, keepdims=True)
    xc = x - mean
    var = jnp.mean(xc * xc, axis=-1, keepdims=True)
    inv = lax.rsqrt(var + eps)
    return xc * inv * gamma + beta


def transformer_encoder_kernel(
    x_ref,                      # (Bt, S, E)  f32
    wqkv_ref, bqkv_ref,         # (E, 3E) bf16, (1, 3E) f32
    w1_ref, b1_ref,             # (E, F)  bf16, (1, F)  f32
    w2_ref, b2_ref,             # (F, E)  bf16, (1, E)  f32
    g1_ref, be1_ref,            # (1, E) f32
    g2_ref, be2_ref,            # (1, E) f32
    o_ref,                      # (Bt, S, E) f32
):
    Bt, S, E = x_ref.shape
    M = Bt * S

    # Fold batch tile into the matmul M dimension (leading-dim merge, layout no-op).
    x = x_ref[...].reshape(M, E)                         # f32 activations

    # ---- fused QKV projection: one MXU matmul, bf16 operands, f32 accumulation ----
    xb = x.astype(jnp.bfloat16)
    qkv = jnp.dot(xb, wqkv_ref[...], preferred_element_type=jnp.float32) + bqkv_ref[...]

    scale = 1.0 / (E ** 0.5)
    # Fold the 1/sqrt(E) scale into q (S x E mults instead of S x S).
    q = (qkv[:, :E] * scale).astype(jnp.bfloat16).reshape(Bt, S, E)
    k = qkv[:, E:2 * E].astype(jnp.bfloat16).reshape(Bt, S, E)
    v = qkv[:, 2 * E:].astype(jnp.bfloat16).reshape(Bt, S, E)

    # ---- attention scores: contract the embedding axis of q and k directly (no k.T copy) ----
    s = lax.dot_general(q, k, (((2,), (2,)), ((0,), (0,))),
                        preferred_element_type=jnp.float32)          # (Bt, S, S) f32

    # Softmax (f32, max-subtracted); denominator reciprocal on the EUP.
    s = s - jnp.max(s, axis=-1, keepdims=True)
    p = jnp.exp(s)
    p = p * pl.reciprocal(jnp.sum(p, axis=-1, keepdims=True), approx=True)

    attn = lax.dot_general(p.astype(jnp.bfloat16), v, (((2,), (1,)), ((0,), (0,))),
                           preferred_element_type=jnp.float32)       # (Bt, S, E) f32
    attn = attn.reshape(M, E)

    # ---- residual + norm1 (dropout = identity in eval) ----
    h = _layernorm(x + attn, g1_ref[...], be1_ref[...])              # f32

    # ---- feed-forward: Linear -> ReLU -> Linear (bf16 MXU operands, f32 accumulate) ----
    ff = jnp.dot(h.astype(jnp.bfloat16), w1_ref[...],
                 preferred_element_type=jnp.float32) + b1_ref[...]
    ff = jnp.maximum(ff, 0.0)
    ff = jnp.dot(ff.astype(jnp.bfloat16), w2_ref[...],
                 preferred_element_type=jnp.float32) + b2_ref[...]

    # ---- residual + norm2 ----
    out = _layernorm(h + ff, g2_ref[...], be2_ref[...])
    o_ref[...] = out.reshape(Bt, S, E).astype(o_ref.dtype)


def transformer_encoder(x, params, *, batch_tile=None):
    """x: (B, S, E) float32. params: dict of f32 weights (see init_params)."""
    B, S, E = x.shape
    F = params["w1"].shape[1]

    # Batch-tile heuristic: fold as many sequences as possible into each grid step (bigger
    # MXU M dim), but keep >= 2 grid steps when B >= 2 so both v7x TensorCores are used.
    if batch_tile is None:
        chosen = None
        for cand in (16, 8, 4, 2, 1):
            if B % cand == 0 and B // cand >= 2:
                chosen = cand
                break
        batch_tile = chosen if chosen is not None else B
    assert B % batch_tile == 0
    grid = (B // batch_tile,)

    # Fuse QKV weights/biases; ship matmul weights in bf16 (f32 accumulation in-kernel).
    wqkv = jnp.concatenate([params["wq"], params["wk"], params["wv"]], axis=1).astype(jnp.bfloat16)
    bqkv = jnp.concatenate([params["bq"], params["bk"], params["bv"]], axis=1)
    w1 = params["w1"].astype(jnp.bfloat16)
    w2 = params["w2"].astype(jnp.bfloat16)

    # Grid-invariant weights: whole array resident in VMEM, no block tiling / pipelining.
    vmem_full = pl.BlockSpec(memory_space=pltpu.MemorySpace.VMEM)

    in_specs = [
        pl.BlockSpec((batch_tile, S, E), lambda b: (b, 0, 0)),   # x
        vmem_full, vmem_full,                                    # wqkv, bqkv
        vmem_full, vmem_full,                                    # w1, b1
        vmem_full, vmem_full,                                    # w2, b2
        vmem_full, vmem_full,                                    # gamma1, beta1
        vmem_full, vmem_full,                                    # gamma2, beta2
    ]
    out_spec = pl.BlockSpec((batch_tile, S, E), lambda b: (b, 0, 0))

    # Cost estimate (whole call): QKV + QK^T + PV + FF matmuls; exp/rsqrt/recip transcendentals.
    flops = 2 * B * S * E * (3 * E + 2 * S + 2 * F)
    transcendentals = B * S * (S + 4)
    weight_bytes = 2 * (wqkv.size + w1.size + w2.size) + 4 * (
        bqkv.size + params["b1"].size + params["b2"].size + 4 * E)
    bytes_accessed = 4 * (x.size + B * S * E) + weight_bytes

    # Explicit VMEM budget: weights + (roughly) double-buffered activation tiles, with margin.
    act_bytes = 2 * 4 * batch_tile * S * (2 * E + 3 * E + S + F + E)
    vmem_limit = int(min(max(2 * (weight_bytes + act_bytes) + (4 << 20), 16 << 20), 48 << 20))

    return pl.pallas_call(
        transformer_encoder_kernel,
        out_shape=jax.ShapeDtypeStruct((B, S, E), jnp.float32),
        grid_spec=pltpu.PrefetchScalarGridSpec(
            num_scalar_prefetch=0,
            grid=grid,
            in_specs=in_specs,
            out_specs=out_spec,
        ),
        compiler_params=pltpu.CompilerParams(
            dimension_semantics=("parallel",),
            vmem_limit_bytes=vmem_limit,
        ),
        cost_estimate=pl.CostEstimate(
            flops=int(flops),
            transcendentals=int(transcendentals),
            bytes_accessed=int(bytes_accessed),
        ),
    )(
        x,
        wqkv, bqkv,
        w1, params["b1"],
        w2, params["b2"],
        params["g1"], params["be1"],
        params["g2"], params["be2"],
    )


def init_params(key, dim_embedding, dim_ff):
    """Deterministic synthetic parameter init. Linear weights stored as (in, out)."""
    ks = jax.random.split(key, 10)
    E, F = dim_embedding, dim_ff
    s = 0.05
    return {
        "wq": jax.random.normal(ks[0], (E, E), jnp.float32) * s,
        "bq": jax.random.normal(ks[1], (1, E), jnp.float32) * s,
        "wk": jax.random.normal(ks[2], (E, E), jnp.float32) * s,
        "bk": jax.random.normal(ks[3], (1, E), jnp.float32) * s,
        "wv": jax.random.normal(ks[4], (E, E), jnp.float32) * s,
        "bv": jax.random.normal(ks[5], (1, E), jnp.float32) * s,
        "w1": jax.random.normal(ks[6], (E, F), jnp.float32) * s,
        "b1": jax.random.normal(ks[7], (1, F), jnp.float32) * s,
        "w2": jax.random.normal(ks[8], (F, E), jnp.float32) * s,
        "b2": jax.random.normal(ks[9], (1, E), jnp.float32) * s,
        "g1": jnp.ones((1, E), jnp.float32),
        "be1": jnp.zeros((1, E), jnp.float32),
        "g2": jnp.ones((1, E), jnp.float32),
        "be2": jnp.zeros((1, E), jnp.float32),
    }


def _reference(x, p):
    """Pure-JAX f32 reference matching the PyTorch forward (eval mode)."""
    E = x.shape[-1]
    q = x @ p["wq"] + p["bq"]
    k = x @ p["wk"] + p["bk"]
    v = x @ p["wv"] + p["bv"]
    scores = (q @ jnp.swapaxes(k, -2, -1)) / (E ** 0.5)
    attn = jax.nn.softmax(scores, axis=-1) @ v

    def ln(y, g, b, eps=1e-5):
        m = jnp.mean(y, axis=-1, keepdims=True)
        var = jnp.mean((y - m) ** 2, axis=-1, keepdims=True)
        return (y - m) / jnp.sqrt(var + eps) * g + b

    h = ln(x + attn, p["g1"], p["be1"])
    ff = jnp.maximum(h @ p["w1"] + p["b1"], 0.0) @ p["w2"] + p["b2"]
    return ln(h + ff, p["g2"], p["be2"])


if __name__ == "__main__":
    B, S, E, F = 4, 8, 32, 64
    key = jax.random.PRNGKey(0)
    kx, kp = jax.random.split(key)
    x = jax.random.normal(kx, (B, S, E), jnp.float32)
    params = init_params(kp, E, F)

    out = transformer_encoder(x, params)
    jax.block_until_ready(out)

    ref = _reference(x, params)
    assert out.shape == (B, S, E)
    # bf16 MXU operands + approx reciprocal => looser tolerance than a pure-f32 kernel.
    err = float(jnp.max(jnp.abs(out - ref)))
    assert err < 5e-2, "mismatch vs reference: max abs err = %g" % err
    print("KERNEL_OK")
</pallas_src>

<mosaic_0001>
module attributes {stable_mosaic.version = 11 : i64} {
  func.func @transformer_encoder_kernel(%arg0: i32, %arg1: memref<2x8x32xf32, #tpu.memory_space<vmem>>, %arg2: memref<32x96xbf16, #tpu.memory_space<vmem>>, %arg3: memref<1x96xf32, #tpu.memory_space<vmem>>, %arg4: memref<32x64xbf16, #tpu.memory_space<vmem>>, %arg5: memref<1x64xf32, #tpu.memory_space<vmem>>, %arg6: memref<64x32xbf16, #tpu.memory_space<vmem>>, %arg7: memref<1x32xf32, #tpu.memory_space<vmem>>, %arg8: memref<1x32xf32, #tpu.memory_space<vmem>>, %arg9: memref<1x32xf32, #tpu.memory_space<vmem>>, %arg10: memref<1x32xf32, #tpu.memory_space<vmem>>, %arg11: memref<1x32xf32, #tpu.memory_space<vmem>>, %arg12: memref<2x8x32xf32, #tpu.memory_space<vmem>>) attributes {dimension_semantics = [#tpu.dimension_semantics<parallel>], iteration_bounds = array<i64: 2>, scalar_prefetch = 0 : i64, scratch_operands = 0 : i64, tpu.core_type = #tpu.core_type<tc>, window_params = [{transform_indices = @transform_0, window_bounds = array<i64: 2, 8, 32>}, {pipeline_mode = #tpu.pipeline_mode<synchronous>, transform_indices = @transform_1, window_bounds = array<i64: 32, 96>}, {pipeline_mode = #tpu.pipeline_mode<synchronous>, transform_indices = @transform_2, window_bounds = array<i64: 1, 96>}, {pipeline_mode = #tpu.pipeline_mode<synchronous>, transform_indices = @transform_3, window_bounds = array<i64: 32, 64>}, {pipeline_mode = #tpu.pipeline_mode<synchronous>, transform_indices = @transform_4, window_bounds = array<i64: 1, 64>}, {pipeline_mode = #tpu.pipeline_mode<synchronous>, transform_indices = @transform_5, window_bounds = array<i64: 64, 32>}, {pipeline_mode = #tpu.pipeline_mode<synchronous>, transform_indices = @transform_6, window_bounds = array<i64: 1, 32>}, {pipeline_mode = #tpu.pipeline_mode<synchronous>, transform_indices = @transform_7, window_bounds = array<i64: 1, 32>}, {pipeline_mode = #tpu.pipeline_mode<synchronous>, transform_indices = @transform_8, window_bounds = array<i64: 1, 32>}, {pipeline_mode = #tpu.pipeline_mode<synchronous>, transform_indices = @transform_9, window_bounds = array<i64: 1, 32>}, {pipeline_mode = #tpu.pipeline_mode<synchronous>, transform_indices = @transform_10, window_bounds = array<i64: 1, 32>}, {transform_indices = @transform_11, window_bounds = array<i64: 2, 8, 32>}]} {
    %c0 = arith.constant 0 : index
    %c0_0 = arith.constant 0 : index
    %c0_1 = arith.constant 0 : index
    %0 = vector.load %arg1[%c0, %c0_0, %c0_1] : memref<2x8x32xf32, #tpu.memory_space<vmem>>, vector<2x8x32xf32>
    %1 = vector.shape_cast %0 : vector<2x8x32xf32> to vector<16x32xf32>
    %2 = arith.truncf %1 : vector<16x32xf32> to vector<16x32xbf16>
    %c0_2 = arith.constant 0 : index
    %c0_3 = arith.constant 0 : index
    %3 = vector.load %arg2[%c0_2, %c0_3] : memref<32x96xbf16, #tpu.memory_space<vmem>>, vector<32x96xbf16>
    %cst = arith.constant dense<0.000000e+00> : vector<16x96xf32>
    %4 = tpu.matmul %2, %3, %cst {dimension_numbers = #tpu.dot_dimension_numbers<[1], [0], [0], [1], [0, 0, 1, 1], [], []>} : vector<16x32xbf16>, vector<32x96xbf16>, vector<16x96xf32> -> vector<16x96xf32>
    %c0_4 = arith.constant 0 : index
    %c0_5 = arith.constant 0 : index
    %5 = vector.load %arg3[%c0_4, %c0_5] : memref<1x96xf32, #tpu.memory_space<vmem>>, vector<1x96xf32>
    %6 = vector.broadcast %5 : vector<1x96xf32> to vector<16x96xf32>
    %7 = arith.addf %4, %6 : vector<16x96xf32>
    %8 = vector.extract_strided_slice %7 {offsets = [0, 0], sizes = [16, 32], strides = [1, 1]} : vector<16x96xf32> to vector<16x32xf32>
    %cst_6 = arith.constant 0.176776692 : f32
    %9 = vector.broadcast %cst_6 : f32 to vector<16x32xf32>
    %10 = arith.mulf %8, %9 : vector<16x32xf32>
    %11 = arith.truncf %10 : vector<16x32xf32> to vector<16x32xbf16>
    %12 = vector.shape_cast %11 : vector<16x32xbf16> to vector<2x8x32xbf16>
    %13 = vector.extract_strided_slice %7 {offsets = [0, 32], sizes = [16, 32], strides = [1, 1]} : vector<16x96xf32> to vector<16x32xf32>
    %14 = arith.truncf %13 : vector<16x32xf32> to vector<16x32xbf16>
    %15 = vector.shape_cast %14 : vector<16x32xbf16> to vector<2x8x32xbf16>
    %16 = vector.extract_strided_slice %7 {offsets = [0, 64], sizes = [16, 32], strides = [1, 1]} : vector<16x96xf32> to vector<16x32xf32>
    %17 = arith.truncf %16 : vector<16x32xf32> to vector<16x32xbf16>
    %18 = vector.shape_cast %17 : vector<16x32xbf16> to vector<2x8x32xbf16>
    %cst_7 = arith.constant dense<0.000000e+00> : vector<2x8x8xf32>
    %19 = tpu.matmul %12, %15, %cst_7 {dimension_numbers = #tpu.dot_dimension_numbers<[2], [2], [1], [1], [0, 0, 0, 1, 1, 1], [0], [0]>} : vector<2x8x32xbf16>, vector<2x8x32xbf16>, vector<2x8x8xf32> -> vector<2x8x8xf32>
    %cst_8 = arith.constant dense<0xFF800000> : vector<2x8xf32>
    %20 = vector.multi_reduction <maximumf>, %19, %cst_8 [2] : vector<2x8x8xf32> to vector<2x8xf32>
    %21 = vector.shape_cast %20 : vector<2x8xf32> to vector<2x8x1xf32>
    %22 = vector.broadcast %21 : vector<2x8x1xf32> to vector<2x8x8xf32>
    %23 = arith.subf %19, %22 : vector<2x8x8xf32>
    %24 = math.exp %23 : vector<2x8x8xf32>
    %cst_9 = arith.constant dense<0.000000e+00> : vector<2x8xf32>
    %25 = vector.multi_reduction <add>, %24, %cst_9 [2] : vector<2x8x8xf32> to vector<2x8xf32>
    %26 = vector.shape_cast %25 : vector<2x8xf32> to vector<2x8x1xf32>
    %27 = tpu.reciprocal %26 {approx = true} : vector<2x8x1xf32> -> vector<2x8x1xf32>
    %28 = vector.broadcast %27 : vector<2x8x1xf32> to vector<2x8x8xf32>
    %29 = arith.mulf %24, %28 : vector<2x8x8xf32>
    %30 = arith.truncf %29 : vector<2x8x8xf32> to vector<2x8x8xbf16>
    %cst_10 = arith.constant dense<0.000000e+00> : vector<2x8x32xf32>
    %31 = tpu.matmul %30, %18, %cst_10 {dimension_numbers = #tpu.dot_dimension_numbers<[2], [1], [1], [2], [0, 0, 0, 1, 1, 2], [0], [0]>} : vector<2x8x8xbf16>, vector<2x8x32xbf16>, vector<2x8x32xf32> -> vector<2x8x32xf32>
    %32 = vector.shape_cast %31 : vector<2x8x32xf32> to vector<16x32xf32>
    %33 = arith.addf %1, %32 : vector<16x32xf32>
    %c0_11 = arith.constant 0 : index
    %c0_12 = arith.constant 0 : index
    %34 = vector.load %arg8[%c0_11, %c0_12] : memref<1x32xf32, #tpu.memory_space<vmem>>, vector<1x32xf32>
    %c0_13 = arith.constant 0 : index
    %c0_14 = arith.constant 0 : index
    %35 = vector.load %arg9[%c0_13, %c0_14] : memref<1x32xf32, #tpu.memory_space<vmem>>, vector<1x32xf32>
    %cst_15 = arith.constant dense<0.000000e+00> : vector<16xf32>
    %36 = vector.multi_reduction <add>, %33, %cst_15 [1] : vector<16x32xf32> to vector<16xf32>
    %37 = vector.shape_cast %36 : vector<16xf32> to vector<16x1xf32>
    %cst_16 = arith.constant 3.200000e+01 : f32
    %38 = vector.broadcast %cst_16 : f32 to vector<16x1xf32>
    %39 = arith.divf %37, %38 : vector<16x1xf32>
    %40 = vector.broadcast %39 : vector<16x1xf32> to vector<16x32xf32>
    %41 = arith.subf %33, %40 : vector<16x32xf32>
    %42 = arith.mulf %41, %41 : vector<16x32xf32>
    %cst_17 = arith.constant dense<0.000000e+00> : vector<16xf32>
    %43 = vector.multi_reduction <add>, %42, %cst_17 [1] : vector<16x32xf32> to vector<16xf32>
    %44 = vector.shape_cast %43 : vector<16xf32> to vector<16x1xf32>
    %cst_18 = arith.constant 3.200000e+01 : f32
    %45 = vector.broadcast %cst_18 : f32 to vector<16x1xf32>
    %46 = arith.divf %44, %45 : vector<16x1xf32>
    %cst_19 = arith.constant 9.99999974E-6 : f32
    %47 = vector.broadcast %cst_19 : f32 to vector<16x1xf32>
    %48 = arith.addf %46, %47 : vector<16x1xf32>
    %49 = math.rsqrt %48 : vector<16x1xf32>
    %50 = vector.broadcast %49 : vector<16x1xf32> to vector<16x32xf32>
    %51 = arith.mulf %41, %50 : vector<16x32xf32>
    %52 = vector.broadcast %34 : vector<1x32xf32> to vector<16x32xf32>
    %53 = arith.mulf %51, %52 : vector<16x32xf32>
    %54 = vector.broadcast %35 : vector<1x32xf32> to vector<16x32xf32>
    %55 = arith.addf %53, %54 : vector<16x32xf32>
    %56 = arith.truncf %55 : vector<16x32xf32> to vector<16x32xbf16>
    %c0_20 = arith.constant 0 : index
    %c0_21 = arith.constant 0 : index
    %57 = vector.load %arg4[%c0_20, %c0_21] : memref<32x64xbf16, #tpu.memory_space<vmem>>, vector<32x64xbf16>
    %cst_22 = arith.constant dense<0.000000e+00> : vector<16x64xf32>
    %58 = tpu.matmul %56, %57, %cst_22 {dimension_numbers = #tpu.dot_dimension_numbers<[1], [0], [0], [1], [0, 0, 1, 1], [], []>} : vector<16x32xbf16>, vector<32x64xbf16>, vector<16x64xf32> -> vector<16x64xf32>
    %c0_23 = arith.constant 0 : index
    %c0_24 = arith.constant 0 : index
    %59 = vector.load %arg5[%c0_23, %c0_24] : memref<1x64xf32, #tpu.memory_space<vmem>>, vector<1x64xf32>
    %60 = vector.broadcast %59 : vector<1x64xf32> to vector<16x64xf32>
    %61 = arith.addf %58, %60 : vector<16x64xf32>
    %cst_25 = arith.constant 0.000000e+00 : f32
    %62 = vector.broadcast %cst_25 : f32 to vector<16x64xf32>
    %63 = arith.maximumf %61, %62 : vector<16x64xf32>
    %64 = arith.truncf %63 : vector<16x64xf32> to vector<16x64xbf16>
    %c0_26 = arith.constant 0 : index
    %c0_27 = arith.constant 0 : index
    %65 = vector.load %arg6[%c0_26, %c0_27] : memref<64x32xbf16, #tpu.memory_space<vmem>>, vector<64x32xbf16>
    %cst_28 = arith.constant dense<0.000000e+00> : vector<16x32xf32>
    %66 = tpu.matmul %64, %65, %cst_28 {dimension_numbers = #tpu.dot_dimension_numbers<[1], [0], [0], [1], [0, 0, 1, 1], [], []>} : vector<16x64xbf16>, vector<64x32xbf16>, vector<16x32xf32> -> vector<16x32xf32>
    %c0_29 = arith.constant 0 : index
    %c0_30 = arith.constant 0 : index
    %67 = vector.load %arg7[%c0_29, %c0_30] : memref<1x32xf32, #tpu.memory_space<vmem>>, vector<1x32xf32>
    %68 = vector.broadcast %67 : vector<1x32xf32> to vector<16x32xf32>
    %69 = arith.addf %66, %68 : vector<16x32xf32>
    %70 = arith.addf %55, %69 : vector<16x32xf32>
    %c0_31 = arith.constant 0 : index
    %c0_32 = arith.constant 0 : index
    %71 = vector.load %arg10[%c0_31, %c0_32] : memref<1x32xf32, #tpu.memory_space<vmem>>, vector<1x32xf32>
    %c0_33 = arith.constant 0 : index
    %c0_34 = arith.constant 0 : index
    %72 = vector.load %arg11[%c0_33, %c0_34] : memref<1x32xf32, #tpu.memory_space<vmem>>, vector<1x32xf32>
    %cst_35 = arith.constant dense<0.000000e+00> : vector<16xf32>
    %73 = vector.multi_reduction <add>, %70, %cst_35 [1] : vector<16x32xf32> to vector<16xf32>
    %74 = vector.shape_cast %73 : vector<16xf32> to vector<16x1xf32>
    %cst_36 = arith.constant 3.200000e+01 : f32
    %75 = vector.broadcast %cst_36 : f32 to vector<16x1xf32>
    %76 = arith.divf %74, %75 : vector<16x1xf32>
    %77 = vector.broadcast %76 : vector<16x1xf32> to vector<16x32xf32>
    %78 = arith.subf %70, %77 : vector<16x32xf32>
    %79 = arith.mulf %78, %78 : vector<16x32xf32>
    %cst_37 = arith.constant dense<0.000000e+00> : vector<16xf32>
    %80 = vector.multi_reduction <add>, %79, %cst_37 [1] : vector<16x32xf32> to vector<16xf32>
    %81 = vector.shape_cast %80 : vector<16xf32> to vector<16x1xf32>
    %cst_38 = arith.constant 3.200000e+01 : f32
    %82 = vector.broadcast %cst_38 : f32 to vector<16x1xf32>
    %83 = arith.divf %81, %82 : vector<16x1xf32>
    %cst_39 = arith.constant 9.99999974E-6 : f32
    %84 = vector.broadcast %cst_39 : f32 to vector<16x1xf32>
    %85 = arith.addf %83, %84 : vector<16x1xf32>
    %86 = math.rsqrt %85 : vector<16x1xf32>
    %87 = vector.broadcast %86 : vector<16x1xf32> to vector<16x32xf32>
    %88 = arith.mulf %78, %87 : vector<16x32xf32>
    %89 = vector.broadcast %71 : vector<1x32xf32> to vector<16x32xf32>
    %90 = arith.mulf %88, %89 : vector<16x32xf32>
    %91 = vector.broadcast %72 : vector<1x32xf32> to vector<16x32xf32>
    %92 = arith.addf %90, %91 : vector<16x32xf32>
    %93 = vector.shape_cast %92 : vector<16x32xf32> to vector<2x8x32xf32>
    %c0_40 = arith.constant 0 : index
    %c0_41 = arith.constant 0 : index
    %c0_42 = arith.constant 0 : index
    %94 = vector.load %arg12[%c0_40, %c0_41, %c0_42] : memref<2x8x32xf32, #tpu.memory_space<vmem>>, vector<2x8x32xf32>
    tpu.vector_store %arg12[%c0_40, %c0_41, %c0_42], %93 {strides = array<i32>} : memref<2x8x32xf32, #tpu.memory_space<vmem>>, vector<2x8x32xf32>,
    return
  }
  func.func @transform_0(%arg0: i32) -> (i32, i32, i32) {
    %c0_i32 = arith.constant 0 : i32
    %c0_i32_0 = arith.constant 0 : i32
    %c0_i32_1 = arith.constant 0 : i32
    return %arg0, %c0_i32, %c0_i32_0 : i32, i32, i32
  }
  func.func @transform_1(%arg0: i32) -> (i32, i32) {
    %c0_i32 = arith.constant 0 : i32
    %c0_i32_0 = arith.constant 0 : i32
    %c0_i32_1 = arith.constant 0 : i32
    return %c0_i32, %c0_i32_0 : i32, i32
  }
  func.func @transform_2(%arg0: i32) -> (i32, i32) {
    %c0_i32 = arith.constant 0 : i32
    %c0_i32_0 = arith.constant 0 : i32
    %c0_i32_1 = arith.constant 0 : i32
    return %c0_i32, %c0_i32_0 : i32, i32
  }
  func.func @transform_3(%arg0: i32) -> (i32, i32) {
    %c0_i32 = arith.constant 0 : i32
    %c0_i32_0 = arith.constant 0 : i32
    %c0_i32_1 = arith.constant 0 : i32
    return %c0_i32, %c0_i32_0 : i32, i32
  }
  func.func @transform_4(%arg0: i32) -> (i32, i32) {
    %c0_i32 = arith.constant 0 : i32
    %c0_i32_0 = arith.constant 0 : i32
    %c0_i32_1 = arith.constant 0 : i32
    return %c0_i32, %c0_i32_0 : i32, i32
  }
  func.func @transform_5(%arg0: i32) -> (i32, i32) {
    %c0_i32 = arith.constant 0 : i32
    %c0_i32_0 = arith.constant 0 : i32
    %c0_i32_1 = arith.constant 0 : i32
    return %c0_i32, %c0_i32_0 : i32, i32
  }
  func.func @transform_6(%arg0: i32) -> (i32, i32) {
    %c0_i32 = arith.constant 0 : i32
    %c0_i32_0 = arith.constant 0 : i32
    %c0_i32_1 = arith.constant 0 : i32
    return %c0_i32, %c0_i32_0 : i32, i32
  }
  func.func @transform_7(%arg0: i32) -> (i32, i32) {
    %c0_i32 = arith.constant 0 : i32
    %c0_i32_0 = arith.constant 0 : i32
    %c0_i32_1 = arith.constant 0 : i32
    return %c0_i32, %c0_i32_0 : i32, i32
  }
  func.func @transform_8(%arg0: i32) -> (i32, i32) {
    %c0_i32 = arith.constant 0 : i32
    %c0_i32_0 = arith.constant 0 : i32
    %c0_i32_1 = arith.constant 0 : i32
    return %c0_i32, %c0_i32_0 : i32, i32
  }
  func.func @transform_9(%arg0: i32) -> (i32, i32) {
    %c0_i32 = arith.constant 0 : i32
    %c0_i32_0 = arith.constant 0 : i32
    %c0_i32_1 = arith.constant 0 : i32
    return %c0_i32, %c0_i32_0 : i32, i32
  }
  func.func @transform_10(%arg0: i32) -> (i32, i32) {
    %c0_i32 = arith.constant 0 : i32
    %c0_i32_0 = arith.constant 0 : i32
    %c0_i32_1 = arith.constant 0 : i32
    return %c0_i32, %c0_i32_0 : i32, i32
  }
  func.func @transform_11(%arg0: i32) -> (i32, i32, i32) {
    %c0_i32 = arith.constant 0 : i32
    %c0_i32_0 = arith.constant 0 : i32
    %c0_i32_1 = arith.constant 0 : i32
    return %arg0, %c0_i32, %c0_i32_0 : i32, i32, i32
  }
}

</mosaic_0001>

<bundles_post_ra>
// kernel: tpu_custom_call.1
= control target key start
LH: loop header
LB: loop body
LE: loop exit
PB: predicated region body
PF: predicated region fallthrough
CT: control target
= control target key end

     0   :  { %s1621_s0 = inlined_call_operand.vmem [shape: f32[4,8,32], index: 0, kind: input, shape index: {}]   ;;  %s1622_s1 = inlined_call_operand.vmem [shape: bf16[32,96], index: 1, kind: input, shape index: {}]   ;;  %s1623_s2 = inlined_call_operand.vmem [shape: f32[1,96], index: 2, kind: input, shape index: {}]   ;;  %s1624_s3 = inlined_call_operand.hbm [shape: bf16[32,64], index: 3, kind: input, shape index: {}]   ;;  %s1625_s4 = inlined_call_operand.vmem [shape: f32[1,64], index: 4, kind: input, shape index: {}]   ;;  %s1626_s5 = inlined_call_operand.vmem [shape: bf16[64,32], index: 5, kind: input, shape index: {}]   ;;  %s1627_s6 = inlined_call_operand.vmem [shape: f32[1,32], index: 6, kind: input, shape index: {}]   ;;  %s1628_s7 = inlined_call_operand.vmem [shape: f32[1,32], index: 7, kind: input, shape index: {}]   ;;  %s1629_s8 = inlined_call_operand.vmem [shape: f32[1,32], index: 8, kind: input, shape index: {}]   ;;  %s1630_s9 = inlined_call_operand.vmem [shape: f32[1,32], index: 9, kind: input, shape index: {}]   ;;  %s1631_s10 = inlined_call_operand.vmem [shape: f32[1,32], index: 10, kind: input, shape index: {}]   ;;  %s1632_s11 = inlined_call_operand.hbm [shape: f32[4,8,32], index: 11, kind: output, shape index: {}]  }
   0x1   :  { %1633 = sst [smem:[#allocation8_spill]] %s1621_s0 }
   0x2   :  { %16 = vsyncpa [#allocation3], 0 }
   0x3   :  { %17 = vsyncpa [#allocation4], 0 }
   0x4   :  { %19 = vsyncpa [#allocation4 + $0x1], 0  ;;  %s1405_s17 = smov 0   ;;  %s1407_s18 = smov 0  }
   0x5   :  { %s1409_s19 = smov 0   ;;  %s1411_s20 = smov 0  }
   0x6 LB: > { %s1426_s21 = sadd.s32 4294967295, %s1333_s20   ;;  %s1045_s22 = sadd.s32 4294967294, %s1333_s20   ;;  %s1333_s20 = sphi %s1411_s20, %s1642_s20   ;;  %s1329_s19 = sphi %s1409_s19, %s1641_s19   ;;  %s1325_s18 = sphi %s1407_s18, %s1640_s18   ;;  %s1321_s17 = sphi %s1405_s17, %s1639_s17  }
   0x7   : > { %s1430_s23 = sadd.s32 1, %s1333_s20   ;;  %s268_s24 = sadd.s32 1, %s1329_s19 }
   0x8   : > { %s265_s25 = ssub.s32 %s1333_s20, %s1430_s23  ;;  %p278_p0 = scmp.ne.s32.totalorder %s1329_s19, %s1325_s18 }
   0x9   : > { %p266_p1 = scmp.eq.s32.totalorder %s265_s25, 0  ;;  %p279_p2 = scmp.eq.s32.totalorder %s1426_s21, 1 }
   0xa   : > { %p284_p3 = scmp.ne.s32.totalorder %s1325_s18, %s1321_s17  ;;  %p285_p4 = scmp.eq.s32.totalorder %s1045_s22, 1 }
   0xb   : > { %s1441_s26 = scalar_select %p266_p1, %s1329_s19, %s268_s24  }
   0xc   : > { %p1443_p5 = por %p279_p2, %p278_p0  ;;  %p1447_p6 = por %p285_p4, %p284_p3 }
   0xd   : > { %p1046_p7 = scmp.ge.s32.totalorder %s1333_s20, 1  ;;  %p292_p8 = scmp.lt.s32.totalorder %s1333_s20, 3 }
   0xe   : > { %s1635_s28 = scalar_select %p1447_p6, 1, 0 }
   0xf   : > { %p1175_p9 = scmp.eq.s32.totalorder %s1426_s21, 0  ;;  %p1454_p10 = pnand %p1046_p7, %p292_p8 }
  0x10   : > { %s1335_s30 = smov [#allocation2]  }
  0x11   : > { %s310_s12 = sshll.u32 %s1335_s30, 4  ;;  %p1167_p11 = pneg %p1454_p10  ;;  %s311_s12 = int_to_ptr.vmem [resolvable:$true] %s310_s12 }
  0x12   : > { %s1254_s13 = scalar_lea.vmem %s311_s12, 256  ;;  %p1262_p3 = scmp.lt.s32.totalorder %s311_s12, %s311_s12 }
  0x13   : > { %p1168_p12 = pnand %p1175_p9, %p1167_p11  ;;  %p1255_p0 = scmp.ne.s32.totalorder %s311_s12, %s1254_s13 }
  0x14   : > { %p1263_p4 = scmp.lt.s32.totalorder %s1254_s13, %s1254_s13 }
  0x15   : > { %p1245_p13 = pneg %p1168_p12 }
  0x16   : > { %p1264_p6 = por %p1263_p4, %p1262_p3 }
  0x17   : > { %p1257_p1 = pnand %p1255_p0, %p1245_p13 }
  0x19   : > { %p1258_p2 = pneg %p1257_p1 }
  0x1b   : > { %p1265_p7 = pnand %p1264_p6, %p1258_p2 }
  0x1d   : > { %1268 = shalt.err (!%p1265_p7)
}
  0x1e   : > { %s1336_s14 = smov 64   ;;  %s1337_s15 = smov 4  }
  0x1f   : > { %1170 = dma.hbm_to_vmem [thread:$0]  (!%p1168_p12), %s1624_s3, 256, %s311_s12, [#allocation3], %s1336_s14, %s1336_s14, %s1337_s15  }
  0x20   : > { %356 = sbr.rel (%p1454_p10) target bundleno = 2110 (0x83e), region = 64 }
  0x25   : > { %1312 = dma.done.wait (%p1175_p9), [#allocation3], 256  }
  0x26   : > { %1314 = vsyncadd (%p1175_p9), [#allocation3], 4294967040  ;;  %s1052_s24 = sshll.u32 %s1426_s21, 1  ;;  %v1338_v0 = vmov 0.0   ;;  %vm1339_vm0 = vmmov 0   ;;  %s1637_s0 = sld [smem:[#allocation8_spill]] }
  0x27   : > { %1109 = vmatprep.subr.bf16.mxu1 %v1338_v0  ;;  %1113 = vmatprep.mubr.msk.bf16.mxu1 %vm1339_vm0, %v1338_v0  ;;  %p397_p6 = scmp.lt.s32.totalorder %s1052_s24, 3  ;;  %v1219_v1 = vld [vmem:[%s1622_s1 + $0x8] sm:$0xff]   ;;  %v1220_v2 = vld [vmem:[%s1622_s1] sm:$0xff]   ;;  %vm430_vm1 = vcmask 261120   ;;  %vm585_vm2 = vcmask 64512   ;;  %s1341_s29 = smov 64  }
  0x28   : > { %1123 = vmatprep.subr.bf16.mxu0 %v1338_v0  ;;  %1125 = vmatprep.mubr.msk.bf16.mxu0 %vm1339_vm0, %v1338_v0  ;;  %v1054_v6 = vld [vmem:[%s1623_s2] ss:$0 sm:$0xff]  ;;  %vm615_vm3 = vcmask 1043456   ;;  %vm864_vm4 = vcmask 523264   ;;  %s393_s22 = sand.u32 1, %s1325_s18   ;;  %s1089_s13 = sshll.u32 %s1426_s21, 8 }
  0x29   : > { %s1644_s24 = smov (!%p397_p6, %s1052_s24), 3  ;;  %1110 = vmatpush3.bf16.msra.mxu1 %v1219_v1  ;;  %s1581_s30 = scalar_lea.sflag [#allocation4], %s393_s22 }
  0x2a   : > { %s1053_s25 = sshll.u32 %s1644_s24, 3  ;;  %1111 = vmatprep.subr.bf16.mxu1 %v1338_v0 }
  0x2c   : > { %s400_s12 = scalar_lea.vmem %s1637_s0, %s1053_s25  ;;  %s1340_s25 = smov 96  }
  0x2d   : > { %v1487_v3 = vld [vmem:[%s400_s12] sm:$0xff]  ;;  %v1489_v4 = vld [vmem:[%s400_s12 + $0x8] sm:$0xff]  ;;  %1112 = vmatpush3.bf16.msra.mxu1 %v1220_v2 }
  0x2e   : > { %v406_v5 = vpack.c.bf16 %v1489_v4, %v1487_v3  ;;  %1117 = vmatprep.subr.bf16.mxu1 %v1338_v0 }
  0x30   : > { %1114 = vmatmul.mubr.msk.bf16.vlgmr.msra.gmra.mxu1 %vm430_vm1, %v406_v5 }
  0x31   : > { %1119 = vmatprep.mubr.msk.bf16.mxu1 %vm1339_vm0, %v1338_v0 }
  0xf0   : > { %v468_v7 = vpop.f32.mrf.mxu1 }
  0xf1   : > { %v469_v8 = vadd.f32 %v1054_v6, %v468_v7 }
  0xf2   : > { %v1115_v9 = vpop.f32.mrf.mxu1 }
  0xf3   : > { %v1087_v10 = vpack.c.bf16 %v469_v8, %v469_v8  ;;  %v475_v17 = vmul.f32 0.17677669, %v469_v8 }
  0xf4   : > { %v471_v11 = vpop.f32.mrf.mxu1 }
  0xf5   : > { %v472_v12 = vadd.f32 %v1054_v6, %v471_v11  ;;  %488 = vrot.lane.b32.xlu0 %v1087_v10, %s1340_s25  ;;  %v1085_v20 = vpack.c.bf16 %v475_v17, %v475_v17 }
  0xf6   : > { %v1116_v13 = vpop.f32.mrf.mxu1 }
  0xf7   : > { %v1088_v14 = vpack.c.bf16 %v472_v12, %v472_v12  ;;  %v476_v21 = vmul.f32 0.17677669, %v472_v12 }
  0xf9   : > { %537 = vrot.lane.b32.xlu0 %v1088_v14, %s1340_s25  ;;  %v1086_v22 = vpack.c.bf16 %v476_v21, %v476_v21  ;;  %s1576_s25 = scalar_lea.hbm %s1632_s11, %s1089_s13 }
 0x167   : > { %v489_v15 = vpop.permute.xlu0 %488 }
 0x168   : > { %v494_v16 = vsel %vm430_vm1, %v489_v15, 0  ;;  %v1222_v15 = vld [vmem:[#allocation2] sm:$0xff]  }
 0x169   : > { %1118 = vmatpush3.bf16.xpose.msra.mxu1 %v494_v16  ;;  %v1223_v16 = vld [vmem:[%s1626_s5 + $0x18] sm:$0xff]  }
 0x16a   : > { %1129 = vmatprep.subr.bf16.mxu1 %v1338_v0 }
 0x16b   : > { %v538_v18 = vpop.permute.xlu0 %537 }
 0x16c   : > { %v543_v19 = vsel %vm430_vm1, %v538_v18, 0 }
 0x16d   : > { %1124 = vmatpush3.bf16.xpose.msra.mxu0 %v543_v19 }
 0x16e   : > { %1135 = vmatprep.subr.bf16.mxu0 %v1338_v0 }
 0x170   : > { %1120 = vmatmul.mubr.msk.bf16.vlgmr.msra.gmra.mxu1 %vm430_vm1, %v1085_v20 }
 0x171   : > { %1131 = vmatprep.mubr.msk.bf16.mxu1 %vm1339_vm0, %v1338_v0 }
 0x174   : > { %1126 = vmatmul.mubr.msk.bf16.vlgmr.msra.gmra.mxu0 %vm430_vm1, %v1086_v22 }
 0x175   : > { %1137 = vmatprep.mubr.msk.bf16.mxu0 %vm1339_vm0, %v1338_v0 }
 0x230   : > { %v530_v23 = vpop.f32.mrf.mxu1 }
 0x231   : > { %v586_v24 = vsel %vm585_vm2, %v530_v23, -inf }
 0x232   : > { %587 = vmax.xlane.f32.xlu1 %v586_v24  ;;  %v1121_v25 = vpop.f32.mrf.mxu1 }
 0x233   : > { %v1066_v25 = vld [vmem:[%s1628_s7] ss:$0 sm:$0xff] }
 0x234   : > { %v533_v26 = vpop.f32.mrf.mxu1  ;;  %v579_v27 = vpop.f32.mrf.mxu0 }
 0x235   : > { %v589_v28 = vsel %vm585_vm2, %v579_v27, -inf }
 0x236   : > { %v1127_v29 = vpop.f32.mrf.mxu0  ;;  %590 = vmax.xlane.f32.xlu1 %v589_v28  ;;  %v1122_v30 = vpop.f32.mrf.mxu1 }
 0x237   : > { %v1067_v29 = vld [vmem:[%s1629_s8] ss:$0 sm:$0xff] }
 0x238   : > { %v582_v31 = vpop.f32.mrf.mxu0 }
 0x23a   : > { %v1128_v32 = vpop.f32.mrf.mxu0 }
 0x247   : > { %610 = vrot.lane.b32.xlu1 %v1087_v10, %s1341_s29 }
 0x2bb   : > { %v588_v33 = vpop.xlane.xlu1 %587 }
 0x2bc   : > { %v592_v34 = vsub.f32 %v530_v23, %v588_v33 }
 0x2be   : > { %v594_v35 = vmul.f32 1.442695, %v592_v34  ;;  %v1224_v34 = vld [vmem:[%s1626_s5 + $0x10] sm:$0xff]  }
 0x2bf   : > { %v591_v36 = vpop.xlane.xlu1 %590 }
 0x2c0   : > { %1227 = vpow2.f32 %v594_v35  ;;  %v593_v37 = vsub.f32 %v579_v27, %v591_v36  ;;  %v1225_v35 = vld [vmem:[%s1626_s5 + $0x8] sm:$0xff]   ;;  %v1226_v36 = vld [vmem:[%s1626_s5] sm:$0xff]  }
 0x2c2   : > { %v596_v38 = vmul.f32 1.442695, %v593_v37  ;;  %v1068_v37 = vld [vmem:[%s1625_s4] ss:$0 sm:$0xff] }
 0x2c3   : > { %v611_v39 = vpop.permute.xlu1 %610 }
 0x2c4   : > { %1229 = vpow2.f32 %v596_v38  ;;  %v617_v40 = vsel %vm615_vm3, %v611_v39, 0 }
 0x2c5   : > { %1130 = vmatpush3.bf16.msra.mxu1 %v617_v40 }
 0x2c6   : > { %1141 = vmatprep.subr.bf16.mxu1 %v1338_v0 }
 0x2cd   : > { %v1228_v41 = vpop.eup %1227 }
 0x2ce   : > { %v598_v42 = vsel %vm585_vm2, %v1228_v41, 0.0 }
 0x2cf   : > { %599 = vadd.xlane.f32.xlu0 %v598_v42 }
 0x2d1   : > { %v1230_v43 = vpop.eup %1229 }
 0x2d2   : > { %v601_v44 = vsel %vm585_vm2, %v1230_v43, 0.0 }
 0x2d3   : > { %602 = vadd.xlane.f32.xlu1 %v601_v44 }
 0x2e4   : > { %659 = vrot.lane.b32.xlu1 %v1088_v14, %s1341_s29  ;;  %v1221_v14 = vld [vmem:[#allocation2 + $0x8] sm:$0xff]   ;;  %s1051_s29 = sshll.u32 %s393_s22, 4 }
 0x2e5   : > { %s395_s14 = scalar_lea.vmem [#allocation5], %s1051_s29  ;;  %s1342_s29 = smov [#allocation5]  }
 0x2e6   : > { %s971_s15 = sshll.u32 %s395_s14, 4  ;;  %s1273_s12 = sshll.u32 %s1342_s29, 4  ;;  %s1578_s15 = int_to_ptr.vmem [resolvable:$true] %s971_s15  ;;  %s1274_s12 = int_to_ptr.vmem [resolvable:$false] %s1273_s12 }
 0x2e7   : > { %s1269_s21 = scalar_lea.vmem %s1578_s15, 256  ;;  %s1275_s13 = scalar_lea.vmem %s1274_s12, 512 }
 0x2e8   : > { %p1270_p8 = scmp.ne.s32.totalorder %s1578_s15, %s1269_s21  ;;  %p1276_p11 = scmp.lt.s32.totalorder %s1578_s15, %s1274_s12 }
 0x2e9   : > { %p1277_p12 = scmp.lt.s32.totalorder %s1275_s13, %s1269_s21 }
 0x2ea   : > { %p1271_p9 = pnand %p1270_p8, %p1443_p5 }
 0x2eb   : > { %p1278_p13 = por %p1277_p12, %p1276_p11 }
 0x2ec   : > { %p1272_p10 = pneg %p1271_p9 }
 0x2ee   : > { %p1279_p0 = pnand %p1278_p13, %p1272_p10 }
 0x358   : > { %v600_v45 = vpop.xlane.xlu0 %599 }
 0x359   : > { %1231 = vrcp.f32 %v600_v45 }
 0x35c   : > { %v603_v46 = vpop.xlane.xlu1 %602 }
 0x35d   : > { %1233 = vrcp.f32 %v603_v46 }
 0x360   : > { %v660_v47 = vpop.permute.xlu1 %659 }
 0x361   : > { %v665_v48 = vsel %vm615_vm3, %v660_v47, 0 }
 0x362   : > { %1136 = vmatpush3.bf16.msra.mxu0 %v665_v48 }
 0x363   : > { %1149 = vmatprep.subr.bf16.mxu0 %v1338_v0 }
 0x366   : > { %v1232_v49 = vpop.eup %1231 }
 0x367   : > { %v606_v50 = vmul.f32 %v1232_v49, %v1228_v41 }
 0x369   : > { %v608_v51 = vpack.c.bf16 %v606_v50, %v606_v50 }
 0x36a   : > { %v1234_v52 = vpop.eup %1233 }
 0x36b   : > { %1132 = vmatmul.mubr.msk.bf16.vlgmr.msra.gmra.mxu1 %vm585_vm2, %v608_v51  ;;  %v607_v53 = vmul.f32 %v1234_v52, %v1230_v43 }
 0x36c   : > { %1145 = vmatprep.mubr.msk.bf16.mxu1 %vm1339_vm0, %v1338_v0  ;;  %1142 = vmatpush3.bf16.msra.mxu1 %v1221_v14 }
 0x36d   : > { %v609_v54 = vpack.c.bf16 %v607_v53, %v607_v53  ;;  %1143 = vmatprep.subr.bf16.mxu1 %v1338_v0 }
 0x36f   : > { %1138 = vmatmul.mubr.msk.bf16.vlgmr.msra.gmra.mxu0 %vm585_vm2, %v609_v54 }
 0x370   : > { %1157 = vmatprep.mubr.msk.bf16.mxu0 %vm1339_vm0, %v1338_v0  ;;  %1144 = vmatpush3.bf16.msra.mxu1 %v1222_v15 }
 0x371   : > { %1150 = vmatpush3.bf16.msra.mxu0 %v1223_v16 }
 0x372   : > { %1151 = vmatprep.subr.bf16.mxu0 %v1338_v0 }
 0x375   : > { %1152 = vmatpush3.bf16.msra.mxu0 %v1224_v34 }
 0x376   : > { %1153 = vmatprep.subr.bf16.mxu0 %v1338_v0 }
 0x379   : > { %1154 = vmatpush3.bf16.msra.mxu0 %v1225_v35 }
 0x37a   : > { %1155 = vmatprep.subr.bf16.mxu0 %v1338_v0  ;;  %v1072_v0 = vld [vmem:[%s1627_s6] ss:$0 sm:$0xff] }
 0x37d   : > { %1156 = vmatpush3.bf16.msra.mxu0 %v1226_v36 }
 0x42b   : > { %v653_v55 = vpop.f32.mrf.mxu1 }
 0x42c   : > { %v707_v56 = vadd.f32 %v653_v55, %v1487_v3 }
 0x42d   : > { %v1133_v57 = vpop.f32.mrf.mxu1 }
 0x42e   : > { %v711_v58 = vsel %vm430_vm1, %v707_v56, 0.0 }
 0x42f   : > { %v701_v59 = vpop.f32.mrf.mxu0  ;;  %712 = vadd.xlane.f32.xlu1 %v711_v58  ;;  %v656_v60 = vpop.f32.mrf.mxu1 }
 0x430   : > { %v708_v61 = vadd.f32 %v701_v59, %v1489_v4 }
 0x431   : > { %v1134_v62 = vpop.f32.mrf.mxu1  ;;  %v1139_v63 = vpop.f32.mrf.mxu0 }
 0x432   : > { %v714_v1 = vsel %vm430_vm1, %v708_v61, 0.0 }
 0x433   : > { %715 = vadd.xlane.f32.xlu0 %v714_v1  ;;  %v704_v2 = vpop.f32.mrf.mxu0 }
 0x435   : > { %v1140_v5 = vpop.f32.mrf.mxu0 }
 0x4b8   : > { %v713_v6 = vpop.xlane.xlu1 %712 }
 0x4b9   : > { %v718_v7 = vmul.f32 0.03125, %v713_v6 }
 0x4bb   : > { %v720_v8 = vsub.f32 %v707_v56, %v718_v7 }
 0x4bc   : > { %v716_v9 = vpop.xlane.xlu0 %715 }
 0x4bd   : > { %v719_v3 = vmul.f32 0.03125, %v716_v9  ;;  %v722_v10 = vmul.f32 %v720_v8, %v720_v8 }
 0x4bf   : > { %v721_v11 = vsub.f32 %v708_v61, %v719_v3  ;;  %v724_v12 = vsel %vm430_vm1, %v722_v10, 0.0 }
 0x4c0   : > { %725 = vadd.xlane.f32.xlu0 %v724_v12  ;;  %v1078_v12 = vld [vmem:[%s1630_s9] ss:$0 sm:$0xff] }
 0x4c1   : > { %v723_v13 = vmul.f32 %v721_v11, %v721_v11 }
 0x4c3   : > { %v727_v4 = vsel %vm430_vm1, %v723_v13, 0.0 }
 0x4c4   : > { %728 = vadd.xlane.f32.xlu0 %v727_v4  ;;  %v1079_v4 = vld [vmem:[%s1631_s10] ss:$0 sm:$0xff] }
 0x549   : > { %v726_v17 = vpop.xlane.xlu0 %725 }
 0x54a   : > { %v730_v18 = vmul.f32 0.03125, %v726_v17 }
 0x54c   : > { %v732_v19 = vadd.f32 1e-05, %v730_v18 }
 0x54d   : > { %v729_v20 = vpop.xlane.xlu0 %728 }
 0x54e   : > { %1235 = vrsqrt.f32 %v732_v19  ;;  %v731_v21 = vmul.f32 0.03125, %v729_v20 }
 0x550   : > { %v733_v22 = vadd.f32 1e-05, %v731_v21 }
 0x552   : > { %1237 = vrsqrt.f32 %v733_v22 }
 0x55b   : > { %v1236_v23 = vpop.eup %1235 }
 0x55c   : > { %v736_v24 = vmul.f32 %v1236_v23, %v720_v8 }
 0x55e   : > { %v744_v28 = vmul.f32 %v1066_v25, %v736_v24 }
 0x55f   : > { %v1238_v26 = vpop.eup %1237 }
 0x560   : > { %v737_v27 = vmul.f32 %v1238_v26, %v721_v11  ;;  %v752_v31 = vadd.f32 %v1067_v29, %v744_v28 }
 0x562   : > { %v745_v30 = vmul.f32 %v1066_v25, %v737_v27 }
 0x564   : > { %v753_v32 = vadd.f32 %v1067_v29, %v745_v30 }
 0x566   : > { %v754_v33 = vpack.c.bf16 %v753_v32, %v752_v31 }
 0x568   : > { %1146 = vmatmul.mubr.msk.bf16.vlgmr.msra.gmra.mxu1 %vm430_vm1, %v754_v33 }
 0x628   : > { %v815_v38 = vpop.f32.mrf.mxu1 }
 0x629   : > { %v816_v40 = vadd.f32 %v1068_v37, %v815_v38 }
 0x62a   : > { %v1147_v39 = vpop.f32.mrf.mxu1 }
 0x62b   : > { %v822_v44 = vmax.f32 %v816_v40, 0.0 }
 0x62c   : > { %v818_v41 = vpop.f32.mrf.mxu1 }
 0x62d   : > { %v819_v42 = vadd.f32 %v1068_v37, %v818_v41 }
 0x62e   : > { %v1148_v43 = vpop.f32.mrf.mxu1 }
 0x62f   : > { %v823_v45 = vmax.f32 %v819_v42, 0.0 }
 0x631   : > { %v824_v46 = vpack.c.bf16 %v823_v45, %v822_v44 }
 0x633   : > { %1158 = vmatmul.mubr.msk.bf16.vlgmr.msra.gmra.mxu0 %vm864_vm4, %v824_v46 }
 0x6f3   : > { %v902_v47 = vpop.f32.mrf.mxu0 }
 0x6f4   : > { %v903_v48 = vadd.f32 %v1072_v0, %v902_v47 }
 0x6f5   : > { %v1159_v49 = vpop.f32.mrf.mxu0 }
 0x6f6   : > { %v909_v50 = vadd.f32 %v903_v48, %v752_v31 }
 0x6f7   : > { %v905_v51 = vpop.f32.mrf.mxu0 }
 0x6f8   : > { %v906_v52 = vadd.f32 %v1072_v0, %v905_v51  ;;  %v913_v53 = vsel %vm430_vm1, %v909_v50, 0.0 }
 0x6f9   : > { %914 = vadd.xlane.f32.xlu0 %v913_v53  ;;  %v1160_v54 = vpop.f32.mrf.mxu0 }
 0x6fa   : > { %v910_v55 = vadd.f32 %v906_v52, %v753_v32 }
 0x6fc   : > { %v916_v56 = vsel %vm430_vm1, %v910_v55, 0.0 }
 0x6fd   : > { %917 = vadd.xlane.f32.xlu0 %v916_v56 }
 0x782   : > { %v915_v57 = vpop.xlane.xlu0 %914 }
 0x783   : > { %v919_v58 = vmul.f32 0.03125, %v915_v57 }
 0x785   : > { %v921_v59 = vsub.f32 %v909_v50, %v919_v58 }
 0x786   : > { %v918_v60 = vpop.xlane.xlu0 %917 }
 0x787   : > { %v920_v61 = vmul.f32 0.03125, %v918_v60  ;;  %v923_v62 = vmul.f32 %v921_v59, %v921_v59 }
 0x789   : > { %v922_v63 = vsub.f32 %v910_v55, %v920_v61  ;;  %v925_v1 = vsel %vm430_vm1, %v923_v62, 0.0 }
 0x78a   : > { %926 = vadd.xlane.f32.xlu0 %v925_v1 }
 0x78b   : > { %v924_v2 = vmul.f32 %v922_v63, %v922_v63 }
 0x78d   : > { %v928_v5 = vsel %vm430_vm1, %v924_v2, 0.0 }
 0x78e   : > { %929 = vadd.xlane.f32.xlu0 %v928_v5 }
 0x813   : > { %v927_v6 = vpop.xlane.xlu0 %926 }
 0x814   : > { %v931_v7 = vmul.f32 0.03125, %v927_v6 }
 0x816   : > { %v933_v8 = vadd.f32 1e-05, %v931_v7 }
 0x817   : > { %v930_v9 = vpop.xlane.xlu0 %929 }
 0x818   : > { %1239 = vrsqrt.f32 %v933_v8  ;;  %v932_v3 = vmul.f32 0.03125, %v930_v9 }
 0x81a   : > { %v934_v10 = vadd.f32 1e-05, %v932_v3 }
 0x81c   : > { %1241 = vrsqrt.f32 %v934_v10 }
 0x825   : > { %v1240_v11 = vpop.eup %1239 }
 0x826   : > { %v937_v13 = vmul.f32 %v1240_v11, %v921_v59 }
 0x828   : > { %v945_v14 = vmul.f32 %v1078_v12, %v937_v13 }
 0x829   : > { %v1242_v15 = vpop.eup %1241 }
 0x82a   : > { %v953_v16 = vadd.f32 %v1079_v4, %v945_v14  ;;  %v938_v17 = vmul.f32 %v1242_v15, %v922_v63 }
 0x82c   : > { %v946_v18 = vmul.f32 %v1078_v12, %v938_v17  ;;  %955 = vst.msk [vmem:[%s395_s14] sm:$0xff] %vm430_vm1, %v953_v16 }
 0x82e   : > { %v954_v19 = vadd.f32 %v1079_v4, %v946_v18 }
 0x830   : > { %956 = vst.msk [vmem:[%s395_s14 + $0x8] sm:$0xff] %vm430_vm1, %v954_v19 }
 0x831   : > { %1282 = shalt.err (!%p1279_p0)
}
 0x832   : > { %s1283_s22 = scalar_lea.hbm %s1576_s25, 256  ;;  %s1287_s24 = scalar_lea.hbm %s1632_s11, 512 }
 0x833   : > { %p1284_p1 = scmp.ne.s32.totalorder %s1576_s25, %s1283_s22  ;;  %p1288_p4 = scmp.lt.s32.totalorder %s1576_s25, %s1632_s11 }
 0x834   : > { %p1289_p7 = scmp.lt.s32.totalorder %s1287_s24, %s1283_s22 }
 0x835   : > { %p1285_p2 = pnand %p1284_p1, %p1443_p5 }
 0x836   : > { %p1290_p6 = por %p1289_p7, %p1288_p4 }
 0x837   : > { %p1286_p3 = pneg %p1285_p2 }
 0x839   : > { %p1291_p8 = pnand %p1290_p6, %p1286_p3 }
 0x83b   : > { %1294 = shalt.err (!%p1291_p8)
}
 0x83c   : > { %s1343_s21 = smov 128   ;;  %s1344_s12 = smov 8  }
 0x83d   : > { %1165 = dma.vmem_to_hbm [thread:$0]  (%p1443_p5), %s1578_s15, 256, %s1576_s25, %s1581_s30, %s1343_s21, %s1343_s21, %s1344_s12  }
 0x83e PF: > { %p1177_p9 = scmp.ge.s32.totalorder %s1333_s20, 2  ;;  %s986_s13 = sand.u32 1, %s1321_s17  }
 0x83f   : > { %p1638_p10 = scmp.ne.s32.totalorder %s1635_s28, 0  ;;  %s987_s0 = scalar_lea.sflag [#allocation4], %s986_s13 }
 0x841   : > { %p1172_p11 = pnand %p1177_p9, %p1638_p10 }
 0x843   : > { %p1173_p12 = pneg %p1172_p11 }
 0x845   : > { %1316 = dma.done.wait (%p1173_p12), %s987_s0, 256  }
 0x846   : > { %1318 = vsyncadd (%p1173_p12), %s987_s0, 4294967040  ;;  %p22_p13 = scmp.ge.s32.totalorder %s1430_s23, 4   ;;  %s1639_s17 = smov %s1325_s18 }
 0x847   : > { %s1640_s18 = smov %s1329_s19  ;;  %s1641_s19 = smov %s1441_s26 }
 0x848   : > { %s1642_s20 = smov %s1430_s23  ;;  %24 = sbr.rel (!%p22_p13) target bundleno = 6 (0x6), region = 104 }
 0x84d   :  { %992 = vsyncpa [#allocation3], 1 }
 0x84e   :  { %994 = vsyncpa [#allocation3 + $0x1], 1 }
 0x84f   :  { %995 = vsyncpa [#allocation4], 1 }
 0x850   :  { %997 = vsyncpa [#allocation4 + $0x1], 1 }

</bundles_post_ra>
